<compile_context>
chip_gen: v5e
topology: v5e:2x2
jax: 0.10.0
libtpu: 0.0.40
codegen_flags: <defaults>
</compile_context>

<pallas_src>
import jax
import jax.numpy as jnp
from jax import lax
from jax.experimental import pallas as pl
from jax.experimental.pallas import tpu as pltpu

NUM_TAGS = 128  # small synthetic tag count


# ----------------------------------------------------------------------------
# Pallas kernel: one grid step = TB batch elements, full forward pass.
# ----------------------------------------------------------------------------
def transnet13_kernel(x_ref, wconv_ref, shift_ref, w1_ref, b1_ref,
                      w2_ref, b2_ref, ln_g_ref, ln_b_ref, wf_ref, bf_ref,
                      out_ref):
    TB, T, C = x_ref.shape
    R = TB * T

    x = x_ref[...].reshape(R, C)                              # (R, C) f32

    # k=3, pad=1 temporal conv: shifted copies of the flattened batch tile.
    # Seam rows between samples (t==0 / t==T-1) are masked to 0.  The mask is
    # an (R, 1) column that broadcasts inside the where (not a full (R, C)
    # iota) -- it only varies along the sublane axis.
    t_idx = lax.broadcasted_iota(jnp.int32, (R, 1), 0) % T    # (R, 1)
    x_prev = jnp.where(t_idx == 0, 0.0, pltpu.roll(x, shift=1, axis=0))
    x_next = jnp.where(t_idx == T - 1, 0.0,
                       pltpu.roll(x, shift=R - 1, axis=0))

    # fused 3-tap conv (+ folded BatchNorm) as one K=3C matmul, bf16 operands
    x_cat = jnp.concatenate([x_prev, x, x_next], axis=-1).astype(jnp.bfloat16)
    conv = jnp.dot(x_cat, wconv_ref[...],
                   preferred_element_type=jnp.float32)        # (R, C) f32
    h = jnp.maximum(conv + shift_ref[...], 0.0)               # BN folded + ReLU

    # --- x = x.mean(dim=1): mean over time, per sample ---
    pooled = jnp.mean(h.reshape(TB, T, C), axis=1)            # (TB, C) f32

    # --- ProjectionHead (dropout = identity in eval, residual_connection) ---
    h1 = jnp.dot(pooled.astype(jnp.bfloat16), w1_ref[...],
                 preferred_element_type=jnp.float32) + b1_ref[...]
    h2 = jnp.dot(jnp.maximum(h1, 0.0).astype(jnp.bfloat16), w2_ref[...],
                 preferred_element_type=jnp.float32) + b2_ref[...] + h1
    mu = jnp.mean(h2, axis=-1, keepdims=True)
    var = jnp.mean((h2 - mu) ** 2, axis=-1, keepdims=True)
    hn = (h2 - mu) * lax.rsqrt(var + 1e-5) * ln_g_ref[...] + ln_b_ref[...]

    # --- fc ---
    out_ref[...] = (jnp.dot(hn.astype(jnp.bfloat16), wf_ref[...],
                            preferred_element_type=jnp.float32) + bf_ref[...])


# ----------------------------------------------------------------------------
# Batch-tile selection (primary perf knob)
# ----------------------------------------------------------------------------
def _pick_batch_tile(B, T, target_rows=4096):
    """~target_rows (=tb*T) rows per grid step; >=2 grid steps; sublane-aligned.

    ~4.3 KB of live VMEM per row (C=128) -> ~18 MiB at 4096 rows, inside the
    48 MiB scoped-VMEM limit set below on all of v5e/v6e/v7x.
    """
    tb = max(1, target_rows // max(T, 1))
    tb = min(tb, max(1, pl.cdiv(B, 2)))   # keep >=2 grid steps (v7x: 2 TCs share grid)
    tb = max(8, ((tb + 7) // 8) * 8)      # sublane-aligned output block
    return tb


# ----------------------------------------------------------------------------
# Wrapper
# ----------------------------------------------------------------------------
def transnet13_forward(x, params, *, tb=None):
    B, T, C = x.shape
    H = params["w1"].shape[1]
    NC = params["wf"].shape[1]
    if tb is None:
        tb = _pick_batch_tile(B, T)

    # Fold eval-mode BatchNorm into the conv: scale output channels of wconv,
    # fold bias+shift into one vector; fuse the 3 taps into a (3C, C) weight.
    bn_scale = params["bn_scale"]                              # (1, C)
    wconv_fused = (params["wconv"] * bn_scale.reshape(1, 1, C)).reshape(3 * C, C)
    conv_shift = params["bconv"] * bn_scale + params["bn_shift"]   # (1, C) f32

    # bf16 MXU operands (f32 accumulation inside the kernel).  NOTE: x is
    # accepted in its producer dtype (f32 here); if the upstream pipeline can
    # emit bf16 x, it is consumed as-is (the kernel casts at the conv matmul)
    # -- do NOT .astype(bf16) in the wrapper, that adds an HBM round trip.
    wconv_fused = wconv_fused.astype(jnp.bfloat16)
    w1 = params["w1"].astype(jnp.bfloat16)
    w2 = params["w2"].astype(jnp.bfloat16)
    wf = params["wf"].astype(jnp.bfloat16)

    def full(shape):
        return pl.BlockSpec(shape, lambda i: (0,) * len(shape))

    # No wrapper-side jnp.pad: grid = cdiv(B, tb).  A ragged last block is
    # handled by Pallas' masked boundary stores; per-row compute is
    # independent across samples and the seam mask keeps out-of-range rows
    # from contaminating valid ones.
    grid = (pl.cdiv(B, tb),)

    out = pl.pallas_call(
        transnet13_kernel,
        out_shape=jax.ShapeDtypeStruct((B, NC), jnp.float32),
        grid_spec=pltpu.PrefetchScalarGridSpec(
            num_scalar_prefetch=0,
            grid=grid,
            in_specs=[
                pl.BlockSpec((tb, T, C), lambda i: (i, 0, 0)),  # x batch tile
                full((3 * C, C)),                               # fused conv weight
                full((1, C)),                                   # folded conv shift
                full((C, H)), full((1, H)),                     # proj linear1
                full((H, H)), full((1, H)),                     # proj linear2
                full((1, H)), full((1, H)),                     # layernorm g, b
                full((H, NC)), full((1, NC)),                   # fc
            ],
            out_specs=pl.BlockSpec((tb, NC), lambda i: (i, 0)),
        ),
        compiler_params=pltpu.CompilerParams(
            dimension_semantics=("parallel",),
            vmem_limit_bytes=48 * 1024 * 1024),
    )(x, wconv_fused, conv_shift, w1, params["b1"], w2, params["b2"],
      params["ln_g"], params["ln_b"], wf, params["bf"])
    return out


# ----------------------------------------------------------------------------
# Pure-JAX f32 reference (for verification; unfolded BN, unfused conv)
# ----------------------------------------------------------------------------
def reference_forward(x, p):
    xp = jnp.pad(x, ((0, 0), (1, 1), (0, 0)))
    conv = (xp[:, :-2] @ p["wconv"][0] + xp[:, 1:-1] @ p["wconv"][1]
            + xp[:, 2:] @ p["wconv"][2] + p["bconv"])
    h = jnp.maximum(conv * p["bn_scale"] + p["bn_shift"], 0.0)
    pooled = jnp.mean(h, axis=1)                               # mean over time
    h1 = pooled @ p["w1"] + p["b1"]
    h2 = jnp.maximum(h1, 0.0) @ p["w2"] + p["b2"] + h1
    mean = h2.mean(-1, keepdims=True)
    var = ((h2 - mean) ** 2).mean(-1, keepdims=True)
    hn = (h2 - mean) / jnp.sqrt(var + 1e-5) * p["ln_g"] + p["ln_b"]
    return hn @ p["wf"] + p["bf"]


# ----------------------------------------------------------------------------
# Deterministic parameter construction (synthetic, not a checkpoint)
# ----------------------------------------------------------------------------
def make_params(key, input_dim, hidden_dim, num_classes):
    ks = jax.random.split(key, 12)
    s = 0.05
    gamma = 1.0 + 0.1 * jax.random.normal(ks[10], (1, input_dim), jnp.float32)
    beta = 0.1 * jax.random.normal(ks[11], (1, input_dim), jnp.float32)
    # BatchNorm1d in eval with fresh running stats (mean=0, var=1), eps=1e-5
    bn_scale = gamma / jnp.sqrt(1.0 + 1e-5)
    bn_shift = beta
    return dict(
        wconv=s * jax.random.normal(ks[0], (3, input_dim, input_dim), jnp.float32),
        bconv=s * jax.random.normal(ks[1], (1, input_dim), jnp.float32),
        bn_scale=bn_scale,
        bn_shift=bn_shift,
        w1=s * jax.random.normal(ks[2], (input_dim, hidden_dim), jnp.float32),
        b1=s * jax.random.normal(ks[3], (1, hidden_dim), jnp.float32),
        w2=s * jax.random.normal(ks[4], (hidden_dim, hidden_dim), jnp.float32),
        b2=s * jax.random.normal(ks[5], (1, hidden_dim), jnp.float32),
        ln_g=1.0 + 0.1 * jax.random.normal(ks[6], (1, hidden_dim), jnp.float32),
        ln_b=0.1 * jax.random.normal(ks[7], (1, hidden_dim), jnp.float32),
        wf=s * jax.random.normal(ks[8], (hidden_dim, num_classes), jnp.float32),
        bf=s * jax.random.normal(ks[9], (1, num_classes), jnp.float32),
    )


if __name__ == "__main__":
    B, T = 16, 8                      # auto tile picker -> tb=8, 2 grid steps
    INPUT_DIM, HIDDEN_DIM = 128, 128

    key = jax.random.PRNGKey(0)
    kx, kp = jax.random.split(key)
    x = jax.random.normal(kx, (B, T, INPUT_DIM), jnp.float32)  # (B, T, C)
    params = make_params(kp, INPUT_DIM, HIDDEN_DIM, NUM_TAGS)

    out = jax.block_until_ready(transnet13_forward(x, params))
    ref = jax.block_until_ready(reference_forward(x, params))

    assert out.shape == (B, NUM_TAGS), out.shape
    # bf16 MXU operands -> loosened tolerance vs. the f32 reference
    if not jnp.allclose(out, ref, atol=5e-2, rtol=5e-2):
        raise AssertionError("Pallas kernel does not match JAX reference")
    print("KERNEL_OK")
</pallas_src>

<mosaic_0001>
module attributes {stable_mosaic.version = 11 : i64} {
  func.func @transnet13_kernel(%arg0: i32, %arg1: memref<8x8x128xf32, #tpu.memory_space<vmem>>, %arg2: memref<384x128xbf16, #tpu.memory_space<vmem>>, %arg3: memref<1x128xf32, #tpu.memory_space<vmem>>, %arg4: memref<128x128xbf16, #tpu.memory_space<vmem>>, %arg5: memref<1x128xf32, #tpu.memory_space<vmem>>, %arg6: memref<128x128xbf16, #tpu.memory_space<vmem>>, %arg7: memref<1x128xf32, #tpu.memory_space<vmem>>, %arg8: memref<1x128xf32, #tpu.memory_space<vmem>>, %arg9: memref<1x128xf32, #tpu.memory_space<vmem>>, %arg10: memref<128x128xbf16, #tpu.memory_space<vmem>>, %arg11: memref<1x128xf32, #tpu.memory_space<vmem>>, %arg12: memref<8x128xf32, #tpu.memory_space<vmem>>) attributes {dimension_semantics = [#tpu.dimension_semantics<parallel>], iteration_bounds = array<i64: 2>, scalar_prefetch = 0 : i64, scratch_operands = 0 : i64, tpu.core_type = #tpu.core_type<tc>, window_params = [{transform_indices = @transform_0, window_bounds = array<i64: 8, 8, 128>}, {pipeline_mode = #tpu.pipeline_mode<synchronous>, transform_indices = @transform_1, window_bounds = array<i64: 384, 128>}, {pipeline_mode = #tpu.pipeline_mode<synchronous>, transform_indices = @transform_2, window_bounds = array<i64: 1, 128>}, {pipeline_mode = #tpu.pipeline_mode<synchronous>, transform_indices = @transform_3, window_bounds = array<i64: 128, 128>}, {pipeline_mode = #tpu.pipeline_mode<synchronous>, transform_indices = @transform_4, window_bounds = array<i64: 1, 128>}, {pipeline_mode = #tpu.pipeline_mode<synchronous>, transform_indices = @transform_5, window_bounds = array<i64: 128, 128>}, {pipeline_mode = #tpu.pipeline_mode<synchronous>, transform_indices = @transform_6, window_bounds = array<i64: 1, 128>}, {pipeline_mode = #tpu.pipeline_mode<synchronous>, transform_indices = @transform_7, window_bounds = array<i64: 1, 128>}, {pipeline_mode = #tpu.pipeline_mode<synchronous>, transform_indices = @transform_8, window_bounds = array<i64: 1, 128>}, {pipeline_mode = #tpu.pipeline_mode<synchronous>, transform_indices = @transform_9, window_bounds = array<i64: 128, 128>}, {pipeline_mode = #tpu.pipeline_mode<synchronous>, transform_indices = @transform_10, window_bounds = array<i64: 1, 128>}, {transform_indices = @transform_11, window_bounds = array<i64: 8, 128>}]} {
    %c0 = arith.constant 0 : index
    %c0_0 = arith.constant 0 : index
    %c0_1 = arith.constant 0 : index
    %0 = vector.load %arg1[%c0, %c0_0, %c0_1] : memref<8x8x128xf32, #tpu.memory_space<vmem>>, vector<8x8x128xf32>
    %1 = vector.shape_cast %0 : vector<8x8x128xf32> to vector<64x128xf32>
    %2 = tpu.iota {dimensions = array<i32: 0>} : vector<64x1xi32>
    %c8_i32 = arith.constant 8 : i32
    %c0_i32 = arith.constant 0 : i32
    %3 = arith.cmpi eq, %c8_i32, %c0_i32 : i32
    %c1_i32 = arith.constant 1 : i32
    %4 = arith.select %3, %c1_i32, %c8_i32 : i32
    %5 = vector.broadcast %4 : i32 to vector<64x1xi32>
    %6 = arith.remsi %2, %5 : vector<64x1xi32>
    %c0_i32_2 = arith.constant 0 : i32
    %7 = vector.broadcast %c0_i32_2 : i32 to vector<64x1xi32>
    %8 = arith.cmpi ne, %6, %7 : vector<64x1xi32>
    %c0_i32_3 = arith.constant 0 : i32
    %9 = vector.broadcast %c0_i32_3 : i32 to vector<64x1xi32>
    %10 = arith.cmpi slt, %6, %9 : vector<64x1xi32>
    %c0_i32_4 = arith.constant 0 : i32
    %11 = arith.cmpi slt, %4, %c0_i32_4 : i32
    %12 = vector.broadcast %11 : i1 to vector<64x1xi1>
    %13 = vector.broadcast %12 : vector<64x1xi1> to vector<64x1xi1>
    %14 = arith.xori %10, %13 : vector<64x1xi1>
    %15 = arith.andi %14, %8 : vector<64x1xi1>
    %16 = vector.broadcast %4 : i32 to vector<64x1xi32>
    %17 = arith.addi %6, %16 : vector<64x1xi32>
    %18 = arith.select %15, %17, %6 : vector<64x1xi1>, vector<64x1xi32>
    %c0_i32_5 = arith.constant 0 : i32
    %19 = vector.broadcast %c0_i32_5 : i32 to vector<64x1xi32>
    %20 = arith.cmpi eq, %18, %19 : vector<64x1xi32>
    %c1_i32_6 = arith.constant 1 : i32
    %21 = tpu.dynamic_rotate %1 by %c1_i32_6 dim 0 : vector<64x128xf32>, i32 -> vector<64x128xf32>
    %cst = arith.constant 0.000000e+00 : f32
    %22 = vector.shape_cast %20 : vector<64x1xi1> to vector<64x1xi1>
    %23 = vector.broadcast %22 : vector<64x1xi1> to vector<64x128xi1>
    %24 = vector.broadcast %cst : f32 to vector<64x128xf32>
    %25 = arith.select %23, %24, %21 : vector<64x128xi1>, vector<64x128xf32>
    %c7_i32 = arith.constant 7 : i32
    %26 = vector.broadcast %c7_i32 : i32 to vector<64x1xi32>
    %27 = arith.cmpi eq, %18, %26 : vector<64x1xi32>
    %c63_i32 = arith.constant 63 : i32
    %28 = tpu.dynamic_rotate %1 by %c63_i32 dim 0 : vector<64x128xf32>, i32 -> vector<64x128xf32>
    %cst_7 = arith.constant 0.000000e+00 : f32
    %29 = vector.shape_cast %27 : vector<64x1xi1> to vector<64x1xi1>
    %30 = vector.broadcast %29 : vector<64x1xi1> to vector<64x128xi1>
    %31 = vector.broadcast %cst_7 : f32 to vector<64x128xf32>
    %32 = arith.select %30, %31, %28 : vector<64x128xi1>, vector<64x128xf32>
    %33 = tpu.concatenate %25, %1, %32 in 1 : vector<64x128xf32>, vector<64x128xf32>, vector<64x128xf32> -> vector<64x384xf32>
    %34 = arith.truncf %33 : vector<64x384xf32> to vector<64x384xbf16>
    %c0_8 = arith.constant 0 : index
    %c0_9 = arith.constant 0 : index
    %35 = vector.load %arg2[%c0_8, %c0_9] : memref<384x128xbf16, #tpu.memory_space<vmem>>, vector<384x128xbf16>
    %cst_10 = arith.constant dense<0.000000e+00> : vector<64x128xf32>
    %36 = tpu.matmul %34, %35, %cst_10 {dimension_numbers = #tpu.dot_dimension_numbers<[1], [0], [0], [1], [0, 0, 1, 1], [], []>} : vector<64x384xbf16>, vector<384x128xbf16>, vector<64x128xf32> -> vector<64x128xf32>
    %c0_11 = arith.constant 0 : index
    %c0_12 = arith.constant 0 : index
    %37 = vector.load %arg3[%c0_11, %c0_12] : memref<1x128xf32, #tpu.memory_space<vmem>>, vector<1x128xf32>
    %38 = vector.broadcast %37 : vector<1x128xf32> to vector<64x128xf32>
    %39 = arith.addf %36, %38 : vector<64x128xf32>
    %cst_13 = arith.constant 0.000000e+00 : f32
    %40 = vector.broadcast %cst_13 : f32 to vector<64x128xf32>
    %41 = arith.maximumf %39, %40 : vector<64x128xf32>
    %42 = vector.shape_cast %41 : vector<64x128xf32> to vector<8x8x128xf32>
    %cst_14 = arith.constant dense<0.000000e+00> : vector<8x128xf32>
    %43 = vector.multi_reduction <add>, %42, %cst_14 [1] : vector<8x8x128xf32> to vector<8x128xf32>
    %cst_15 = arith.constant 8.000000e+00 : f32
    %44 = vector.broadcast %cst_15 : f32 to vector<8x128xf32>
    %45 = arith.divf %43, %44 : vector<8x128xf32>
    %46 = arith.truncf %45 : vector<8x128xf32> to vector<8x128xbf16>
    %c0_16 = arith.constant 0 : index
    %c0_17 = arith.constant 0 : index
    %47 = vector.load %arg4[%c0_16, %c0_17] : memref<128x128xbf16, #tpu.memory_space<vmem>>, vector<128x128xbf16>
    %cst_18 = arith.constant dense<0.000000e+00> : vector<8x128xf32>
    %48 = tpu.matmul %46, %47, %cst_18 {dimension_numbers = #tpu.dot_dimension_numbers<[1], [0], [0], [1], [0, 0, 1, 1], [], []>} : vector<8x128xbf16>, vector<128x128xbf16>, vector<8x128xf32> -> vector<8x128xf32>
    %c0_19 = arith.constant 0 : index
    %c0_20 = arith.constant 0 : index
    %49 = vector.load %arg5[%c0_19, %c0_20] : memref<1x128xf32, #tpu.memory_space<vmem>>, vector<1x128xf32>
    %50 = vector.broadcast %49 : vector<1x128xf32> to vector<8x128xf32>
    %51 = arith.addf %48, %50 : vector<8x128xf32>
    %cst_21 = arith.constant 0.000000e+00 : f32
    %52 = vector.broadcast %cst_21 : f32 to vector<8x128xf32>
    %53 = arith.maximumf %51, %52 : vector<8x128xf32>
    %54 = arith.truncf %53 : vector<8x128xf32> to vector<8x128xbf16>
    %c0_22 = arith.constant 0 : index
    %c0_23 = arith.constant 0 : index
    %55 = vector.load %arg6[%c0_22, %c0_23] : memref<128x128xbf16, #tpu.memory_space<vmem>>, vector<128x128xbf16>
    %cst_24 = arith.constant dense<0.000000e+00> : vector<8x128xf32>
    %56 = tpu.matmul %54, %55, %cst_24 {dimension_numbers = #tpu.dot_dimension_numbers<[1], [0], [0], [1], [0, 0, 1, 1], [], []>} : vector<8x128xbf16>, vector<128x128xbf16>, vector<8x128xf32> -> vector<8x128xf32>
    %c0_25 = arith.constant 0 : index
    %c0_26 = arith.constant 0 : index
    %57 = vector.load %arg7[%c0_25, %c0_26] : memref<1x128xf32, #tpu.memory_space<vmem>>, vector<1x128xf32>
    %58 = vector.broadcast %57 : vector<1x128xf32> to vector<8x128xf32>
    %59 = arith.addf %56, %58 : vector<8x128xf32>
    %60 = arith.addf %59, %51 : vector<8x128xf32>
    %cst_27 = arith.constant dense<0.000000e+00> : vector<8xf32>
    %61 = vector.multi_reduction <add>, %60, %cst_27 [1] : vector<8x128xf32> to vector<8xf32>
    %62 = vector.shape_cast %61 : vector<8xf32> to vector<8x1xf32>
    %cst_28 = arith.constant 1.280000e+02 : f32
    %63 = vector.broadcast %cst_28 : f32 to vector<8x1xf32>
    %64 = arith.divf %62, %63 : vector<8x1xf32>
    %65 = vector.broadcast %64 : vector<8x1xf32> to vector<8x128xf32>
    %66 = arith.subf %60, %65 : vector<8x128xf32>
    %67 = arith.mulf %66, %66 : vector<8x128xf32>
    %cst_29 = arith.constant dense<0.000000e+00> : vector<8xf32>
    %68 = vector.multi_reduction <add>, %67, %cst_29 [1] : vector<8x128xf32> to vector<8xf32>
    %69 = vector.shape_cast %68 : vector<8xf32> to vector<8x1xf32>
    %cst_30 = arith.constant 1.280000e+02 : f32
    %70 = vector.broadcast %cst_30 : f32 to vector<8x1xf32>
    %71 = arith.divf %69, %70 : vector<8x1xf32>
    %72 = vector.broadcast %64 : vector<8x1xf32> to vector<8x128xf32>
    %73 = arith.subf %60, %72 : vector<8x128xf32>
    %cst_31 = arith.constant 9.99999974E-6 : f32
    %74 = vector.broadcast %cst_31 : f32 to vector<8x1xf32>
    %75 = arith.addf %71, %74 : vector<8x1xf32>
    %76 = math.rsqrt %75 : vector<8x1xf32>
    %77 = vector.broadcast %76 : vector<8x1xf32> to vector<8x128xf32>
    %78 = arith.mulf %73, %77 : vector<8x128xf32>
    %c0_32 = arith.constant 0 : index
    %c0_33 = arith.constant 0 : index
    %79 = vector.load %arg8[%c0_32, %c0_33] : memref<1x128xf32, #tpu.memory_space<vmem>>, vector<1x128xf32>
    %80 = vector.broadcast %79 : vector<1x128xf32> to vector<8x128xf32>
    %81 = arith.mulf %78, %80 : vector<8x128xf32>
    %c0_34 = arith.constant 0 : index
    %c0_35 = arith.constant 0 : index
    %82 = vector.load %arg9[%c0_34, %c0_35] : memref<1x128xf32, #tpu.memory_space<vmem>>, vector<1x128xf32>
    %83 = vector.broadcast %82 : vector<1x128xf32> to vector<8x128xf32>
    %84 = arith.addf %81, %83 : vector<8x128xf32>
    %85 = arith.truncf %84 : vector<8x128xf32> to vector<8x128xbf16>
    %c0_36 = arith.constant 0 : index
    %c0_37 = arith.constant 0 : index
    %86 = vector.load %arg10[%c0_36, %c0_37] : memref<128x128xbf16, #tpu.memory_space<vmem>>, vector<128x128xbf16>
    %cst_38 = arith.constant dense<0.000000e+00> : vector<8x128xf32>
    %87 = tpu.matmul %85, %86, %cst_38 {dimension_numbers = #tpu.dot_dimension_numbers<[1], [0], [0], [1], [0, 0, 1, 1], [], []>} : vector<8x128xbf16>, vector<128x128xbf16>, vector<8x128xf32> -> vector<8x128xf32>
    %c0_39 = arith.constant 0 : index
    %c0_40 = arith.constant 0 : index
    %88 = vector.load %arg11[%c0_39, %c0_40] : memref<1x128xf32, #tpu.memory_space<vmem>>, vector<1x128xf32>
    %89 = vector.broadcast %88 : vector<1x128xf32> to vector<8x128xf32>
    %90 = arith.addf %87, %89 : vector<8x128xf32>
    %c0_41 = arith.constant 0 : index
    %c0_42 = arith.constant 0 : index
    %91 = vector.load %arg12[%c0_41, %c0_42] : memref<8x128xf32, #tpu.memory_space<vmem>>, vector<8x128xf32>
    tpu.vector_store %arg12[%c0_41, %c0_42], %90 {strides = array<i32>} : memref<8x128xf32, #tpu.memory_space<vmem>>, vector<8x128xf32>,
    return
  }
  func.func @transform_0(%arg0: i32) -> (i32, i32, i32) {
    %c0_i32 = arith.constant 0 : i32
    %c0_i32_0 = arith.constant 0 : i32
    %c0_i32_1 = arith.constant 0 : i32
    return %arg0, %c0_i32, %c0_i32_0 : i32, i32, i32
  }
  func.func @transform_1(%arg0: i32) -> (i32, i32) {
    %c0_i32 = arith.constant 0 : i32
    %c0_i32_0 = arith.constant 0 : i32
    %c0_i32_1 = arith.constant 0 : i32
    return %c0_i32, %c0_i32_0 : i32, i32
  }
  func.func @transform_2(%arg0: i32) -> (i32, i32) {
    %c0_i32 = arith.constant 0 : i32
    %c0_i32_0 = arith.constant 0 : i32
    %c0_i32_1 = arith.constant 0 : i32
    return %c0_i32, %c0_i32_0 : i32, i32
  }
  func.func @transform_3(%arg0: i32) -> (i32, i32) {
    %c0_i32 = arith.constant 0 : i32
    %c0_i32_0 = arith.constant 0 : i32
    %c0_i32_1 = arith.constant 0 : i32
    return %c0_i32, %c0_i32_0 : i32, i32
  }
  func.func @transform_4(%arg0: i32) -> (i32, i32) {
    %c0_i32 = arith.constant 0 : i32
    %c0_i32_0 = arith.constant 0 : i32
    %c0_i32_1 = arith.constant 0 : i32
    return %c0_i32, %c0_i32_0 : i32, i32
  }
  func.func @transform_5(%arg0: i32) -> (i32, i32) {
    %c0_i32 = arith.constant 0 : i32
    %c0_i32_0 = arith.constant 0 : i32
    %c0_i32_1 = arith.constant 0 : i32
    return %c0_i32, %c0_i32_0 : i32, i32
  }
  func.func @transform_6(%arg0: i32) -> (i32, i32) {
    %c0_i32 = arith.constant 0 : i32
    %c0_i32_0 = arith.constant 0 : i32
    %c0_i32_1 = arith.constant 0 : i32
    return %c0_i32, %c0_i32_0 : i32, i32
  }
  func.func @transform_7(%arg0: i32) -> (i32, i32) {
    %c0_i32 = arith.constant 0 : i32
    %c0_i32_0 = arith.constant 0 : i32
    %c0_i32_1 = arith.constant 0 : i32
    return %c0_i32, %c0_i32_0 : i32, i32
  }
  func.func @transform_8(%arg0: i32) -> (i32, i32) {
    %c0_i32 = arith.constant 0 : i32
    %c0_i32_0 = arith.constant 0 : i32
    %c0_i32_1 = arith.constant 0 : i32
    return %c0_i32, %c0_i32_0 : i32, i32
  }
  func.func @transform_9(%arg0: i32) -> (i32, i32) {
    %c0_i32 = arith.constant 0 : i32
    %c0_i32_0 = arith.constant 0 : i32
    %c0_i32_1 = arith.constant 0 : i32
    return %c0_i32, %c0_i32_0 : i32, i32
  }
  func.func @transform_10(%arg0: i32) -> (i32, i32) {
    %c0_i32 = arith.constant 0 : i32
    %c0_i32_0 = arith.constant 0 : i32
    %c0_i32_1 = arith.constant 0 : i32
    return %c0_i32, %c0_i32_0 : i32, i32
  }
  func.func @transform_11(%arg0: i32) -> (i32, i32) {
    %c0_i32 = arith.constant 0 : i32
    %c0_i32_0 = arith.constant 0 : i32
    return %arg0, %c0_i32 : i32, i32
  }
}

</mosaic_0001>

<bundles_post_ra>
// kernel: tpu_custom_call.1
= control target key start
LH: loop header
LB: loop body
LE: loop exit
PB: predicated region body
PF: predicated region fallthrough
CT: control target
= control target key end

     0   :  { %s2495_s0 = inlined_call_operand.hbm [shape: f32[16,8,128], index: 0, kind: input, shape index: {}]   ;;  %s2496_s1 = inlined_call_operand.hbm [shape: bf16[384,128], index: 1, kind: input, shape index: {}]   ;;  %s2497_s2 = inlined_call_operand.vmem [shape: f32[1,128], index: 2, kind: input, shape index: {}]   ;;  %s2498_s3 = inlined_call_operand.hbm [shape: bf16[128,128], index: 3, kind: input, shape index: {}]   ;;  %s2499_s4 = inlined_call_operand.vmem [shape: f32[1,128], index: 4, kind: input, shape index: {}]   ;;  %s2500_s5 = inlined_call_operand.hbm [shape: bf16[128,128], index: 5, kind: input, shape index: {}]   ;;  %s2501_s6 = inlined_call_operand.vmem [shape: f32[1,128], index: 6, kind: input, shape index: {}]   ;;  %s2502_s7 = inlined_call_operand.vmem [shape: f32[1,128], index: 7, kind: input, shape index: {}]   ;;  %s2503_s8 = inlined_call_operand.vmem [shape: f32[1,128], index: 8, kind: input, shape index: {}]   ;;  %s2504_s9 = inlined_call_operand.hbm [shape: bf16[128,128], index: 9, kind: input, shape index: {}]   ;;  %s2505_s10 = inlined_call_operand.vmem [shape: f32[1,128], index: 10, kind: input, shape index: {}]   ;;  %s2506_s11 = inlined_call_operand.hbm [shape: f32[16,128], index: 11, kind: output, shape index: {}]  }
   0x1   :  { %2508 = sst [smem:[#allocation17_spill]] %s2496_s1 }
   0x2   :  { %2509 = sst [smem:[#allocation18_spill]] %s2498_s3 }
   0x3   :  { %2510 = sst [smem:[#allocation19_spill]] %s2500_s5 }
   0x4   :  { %2511 = sst [smem:[#allocation20_spill]] %s2504_s9 }
   0x5   :  { %16 = vsyncpa [#allocation3], 0 }
   0x6   :  { %18 = vsyncpa [#allocation3 + $0x1], 0 }
   0x7   :  { %19 = vsyncpa [#allocation6], 0 }
   0x8   :  { %20 = vsyncpa [#allocation9], 0 }
   0x9   :  { %21 = vsyncpa [#allocation4], 0 }
   0xa   :  { %23 = vsyncpa [#allocation4 + $0x1], 0  ;;  %s2219_s17 = smov 0   ;;  %s2221_s18 = smov 0  }
   0xb   :  { %s2223_s19 = smov 0   ;;  %s2225_s20 = smov 0  }
   0xc LB: > { %s2240_s21 = sadd.s32 4294967295, %s2147_s20   ;;  %s1500_s22 = sadd.s32 4294967294, %s2147_s20   ;;  %s2147_s20 = sphi %s2225_s20, %s2528_s20   ;;  %s2143_s19 = sphi %s2223_s19, %s2527_s19   ;;  %s2139_s18 = sphi %s2221_s18, %s2526_s18   ;;  %s2135_s17 = sphi %s2219_s17, %s2525_s17  }
   0xd   : > { %p49_p0 = scmp.ne.s32.totalorder %s2139_s18, %s2135_s17  ;;  %p50_p1 = scmp.eq.s32.totalorder %s2240_s21, 0 }
   0xe   : > { %p283_p2 = scmp.eq.s32.totalorder %s2240_s21, 1  ;;  %p289_p3 = scmp.eq.s32.totalorder %s1500_s22, 1 }
   0xf   : > { %p2249_p4 = por %p50_p1, %p49_p0  ;;  %p1501_p5 = scmp.ge.s32.totalorder %s2147_s20, 1 }
  0x10   : > { %p2254_p6 = por %p289_p3, %p49_p0  ;;  %p296_p7 = scmp.lt.s32.totalorder %s2147_s20, 3 }
  0x11   : > { %s2515_s1 = sld [smem:[#allocation17_spill]]  ;;  %s2149_s29 = smov [#allocation5]  }
  0x12   : > { %s2513_s24 = scalar_select %p2254_p6, 1, 0 }
  0x13   : > { %p2262_p8 = pnand %p1501_p5, %p296_p7  ;;  %s309_s30 = sshll.u32 %s2149_s29, 4  ;;  %s310_s30 = int_to_ptr.vmem [resolvable:$true] %s309_s30 }
  0x14   : > { %2514 = sst [smem:[#allocation16_spill]] %s2513_s24  ;;  %s2150_s16 = smov 64  }
  0x15   : > { %p1838_p9 = pneg %p2262_p8  ;;  %s2518_s5 = sld [smem:[#allocation19_spill]] }
  0x16   : > { %s2151_s22 = smov 4   ;;  %s2152_s25 = smov [#allocation8]  }
  0x17   : > { %s307_s27 = sshll.u32 %s2515_s1, 4  ;;  %p2270_p10 = pnand %p1838_p9, %p50_p1  ;;  %s308_s27 = int_to_ptr.hbm [resolvable:$true] %s307_s27 }
  0x18   : > { %s343_s26 = sshll.u32 %s2152_s25, 4  ;;  %s2519_s3 = sld [smem:[#allocation18_spill]]  ;;  %s344_s26 = int_to_ptr.vmem [resolvable:$true] %s343_s26 }
  0x19   : > { %1841 = dma.hbm_to_vmem [thread:$0]  (!%p2270_p10), %s308_s27, 3072, %s310_s30, [#allocation6], %s2150_s16, %s2150_s16, %s2151_s22  }
  0x1a   : > { %s2520_s9 = sld [smem:[#allocation20_spill]]  ;;  %s2153_s30 = smov [#allocation7]  }
  0x1b   : > { %s341_s15 = sshll.u32 %s2518_s5, 4  ;;  %s326_s25 = sshll.u32 %s2153_s30, 4  ;;  %s342_s15 = int_to_ptr.hbm [resolvable:$true] %s341_s15  ;;  %s327_s25 = int_to_ptr.vmem [resolvable:$true] %s326_s25 }
  0x1c   : > { %1847 = dma.hbm_to_vmem [thread:$0]  (!%p2270_p10), %s342_s15, 1024, %s344_s26, [#allocation9], %s2150_s16, %s2150_s16, %s2151_s22  }
  0x1d   : > { %s2154_s1 = smov [#allocation10]   ;;  %s2293_s15 = sadd.s32 1, %s2147_s20  }
  0x1e   : > { %s324_s24 = sshll.u32 %s2519_s3, 4  ;;  %s366_s29 = sshll.u32 %s2154_s1, 4  ;;  %s325_s24 = int_to_ptr.hbm [resolvable:$true] %s324_s24  ;;  %s367_s29 = int_to_ptr.vmem [resolvable:$true] %s366_s29 }
  0x1f   : > { %1844 = dma.hbm_to_vmem [thread:$0]  (!%p2270_p10), %s325_s24, 1024, %s327_s25, [#allocation6], %s2150_s16, %s2150_s16, %s2151_s22  }
  0x20   : > { %s364_s27 = sshll.u32 %s2520_s9, 4  ;;  %s36_s26 = sadd.s32 1, %s2143_s19  ;;  %s365_s27 = int_to_ptr.hbm [resolvable:$true] %s364_s27 }
  0x21   : > { %1850 = dma.hbm_to_vmem [thread:$0]  (!%p2270_p10), %s365_s27, 1024, %s367_s29, [#allocation9], %s2150_s16, %s2150_s16, %s2151_s22  }
  0x22   : > { %s33_s13 = ssub.s32 %s2147_s20, %s2293_s15  ;;  %p43_p12 = scmp.ne.s32.totalorder %s2143_s19, %s2139_s18 }
  0x23   : > { %p34_p13 = scmp.eq.s32.totalorder %s33_s13, 0  ;;  %p44_p0 = scmp.eq.s32.totalorder %s2147_s20, 0 }
  0x24   : > { %p2303_p3 = por %p283_p2, %p43_p12  ;;  %p1863_p5 = scmp.lt.s32.totalorder %s2147_s20, 2 }
  0x25   : > { %s2309_s24 = scalar_select %p34_p13, %s2143_s19, %s36_s26  }
  0x26   : > { %p45_p7 = por %p44_p0, %p43_p12  ;;  %s383_s30 = sand.u32 1, %s2143_s19  }
  0x27   : > { %s1507_s12 = sshll.u32 %s383_s30, 6  ;;  %s1753_s16 = sshll.u32 %s2147_s20, 6 }
  0x28   : > { %s392_s25 = scalar_lea.hbm %s2495_s0, %s1753_s16  ;;  %s387_s1 = scalar_lea.vmem [#allocation2], %s1507_s12 }
  0x29   : > { %s395_s29 = sshll.u32 %s387_s1, 4  ;;  %s393_s13 = sshll.u32 %s392_s25, 4  ;;  %s396_s29 = int_to_ptr.vmem [resolvable:$true] %s395_s29  ;;  %s394_s13 = int_to_ptr.hbm [resolvable:$true] %s393_s13 }
  0x2a   : > { %p2316_p2 = pnand %p1863_p5, %p45_p7  ;;  %s384_s26 = scalar_lea.sflag [#allocation3], %s383_s30 }
  0x2b   : > { %s2043_s5 = sshra.s32 %s394_s13, 4  ;;  %s2050_s22 = scalar_lea.hbm %s2495_s0, 128  ;;  %s2044_s5 = int_to_ptr.hbm [resolvable:$true] %s2043_s5 }
  0x2c   : > { %s2045_s9 = scalar_lea.hbm %s2044_s5, 64  ;;  %p2047_p10 = pneg %p2316_p2 }
  0x2d   : > { %p2046_p9 = scmp.ne.s32.totalorder %s2044_s5, %s2045_s9  ;;  %p2051_p0 = scmp.lt.s32.totalorder %s2044_s5, %s2495_s0 }
  0x2e   : > { %p2052_p5 = scmp.lt.s32.totalorder %s2050_s22, %s2045_s9 }
  0x2f   : > { %p2048_p12 = pnand %p2047_p10, %p2046_p9 }
  0x30   : > { %p2053_p7 = por %p2052_p5, %p2051_p0 }
  0x31   : > { %p2049_p13 = pneg %p2048_p12 }
  0x33   : > { %p2054_p11 = pnand %p2053_p7, %p2049_p13 }
  0x35   : > { %2057 = shalt.err (!%p2054_p11)
}
  0x36   : > { %s2155_s30 = smov 128   ;;  %s2156_s1 = smov 8  }
  0x37   : > { %1854 = dma.hbm_to_vmem [thread:$0]  (!%p2316_p2), %s394_s13, 1024, %s396_s29, %s384_s26, %s2155_s30, %s2155_s30, %s2156_s1  }
  0x38   : > { %407 = sbr.rel (%p2262_p8) target bundleno = 989 (0x3dd), region = 64  ;;  %s2333_s16 = sand.u32 (!%p2262_p8), 1, %s2139_s18  }
  0x39   : > { %s1511_s12 = sshll.u32 (!%p2262_p8), %s2333_s16, 6  ;;  %s410_s5 = scalar_lea.sflag (!%p2262_p8), [#allocation3], %s2333_s16 }
  0x3a   : > { %s2337_s9 = scalar_lea.vmem (!%p2262_p8), [#allocation2], %s1511_s12 }
  0x3d   : > { %2118 = dma.done.wait (%p2249_p4), %s410_s5, 1024  }
  0x3e   : > { %2120 = vsyncadd (%p2249_p4), %s410_s5, 4294966272 }
  0x3f   : > { %2122 = dma.done.wait (%p50_p1), [#allocation6], 4096  }
  0x40   : > { %2124 = vsyncadd (%p50_p1), [#allocation6], 4294963200 }
  0x41   : > { %2126 = dma.done.wait (%p50_p1), [#allocation9], 2048  }
  0x42   : > { %2128 = vsyncadd (%p50_p1), [#allocation9], 4294965248  ;;  %v1761_v0 = vld [vmem:[#allocation5 + $0x38] sm:$0xff]  ;;  %v1760_v3 = vld [vmem:[#allocation5 + $0x30] sm:$0xff]  ;;  %v482_v12 = vlaneseq  ;;  %s1750_s1 = sshll.u32 %s2240_s21, 3  ;;  %s1516_s12 = sshll.u32 %s2333_s16, 3 }
  0x43   : > { %v1769_v1 = vld [vmem:[#allocation5 + $0x78] sm:$0xff]  ;;  %893 = vmatpush.bf16.msra.mxu0 %v1761_v0  ;;  %v1768_v4 = vld [vmem:[#allocation5 + $0x70] sm:$0xff]  ;;  %v1759_v6 = vld [vmem:[#allocation5 + $0x28] sm:$0xff]  ;;  %s1387_s3 = scalar_lea.hbm %s2506_s11, %s1750_s1  ;;  %s472_s29 = scalar_lea.vmem [#allocation11], %s1516_s12 }
  0x44   : > { %v1777_v2 = vld [vmem:[#allocation5 + $0xb8] sm:$0xff]  ;;  %922 = vmatpush.bf16.msra.mxu1 %v1769_v1  ;;  %v1776_v5 = vld [vmem:[#allocation5 + $0xb0] sm:$0xff]  ;;  %v1767_v7 = vld [vmem:[#allocation5 + $0x68] sm:$0xff]  ;;  %v2351_v16 = vshrl.u32 %v482_v12, 7  ;;  %s1389_s13 = sshll.u32 %s472_s29, 4  ;;  %s1391_s26 = sshll.u32 %s1387_s3, 4  ;;  %s1390_s13 = int_to_ptr.vmem [resolvable:$true] %s1389_s13  ;;  %s1392_s26 = int_to_ptr.hbm [resolvable:$true] %s1391_s26 }
  0x45   : > { %951 = vmatpush.bf16.msra.mxu2 %v1777_v2  ;;  %v1775_v8 = vld [vmem:[#allocation5 + $0xa8] sm:$0xff]  ;;  %v1758_v9 = vld [vmem:[#allocation5 + $0x20] sm:$0xff]  ;;  %v1757_v13 = vld [vmem:[#allocation5 + $0x18] sm:$0xff]  ;;  %s1377_s22 = scalar_lea.sflag [#allocation4], %s2333_s16  ;;  %s2087_s21 = sshra.s32 %s1392_s26, 4  ;;  %s2088_s21 = int_to_ptr.hbm [resolvable:$true] %s2087_s21 }
  0x46   : > { %v1766_v10 = vld [vmem:[#allocation5 + $0x60] sm:$0xff]  ;;  %v1765_v14 = vld [vmem:[#allocation5 + $0x58] sm:$0xff]  ;;  %v1756_v17 = vld [vmem:[#allocation5 + $0x10] sm:$0xff]  ;;  %v484_v23 = vadd.s32 8, %v2351_v16  ;;  %v495_v25 = vand.u32 7, %v2351_v16  ;;  %vm603_vm0 = vcmp.lt.s32.totalorder %v2351_v16, 1  ;;  %p2094_p11 = scmp.lt.s32.totalorder %s2088_s21, %s2506_s11 }
  0x47   : > { %894 = vmatpush.bf16.msra.mxu0 %v1760_v3  ;;  %v1774_v11 = vld [vmem:[#allocation5 + $0xa0] sm:$0xff]  ;;  %v1773_v15 = vld [vmem:[#allocation5 + $0x98] sm:$0xff]  ;;  %v1764_v18 = vld [vmem:[#allocation5 + $0x50] sm:$0xff]  ;;  %vm652_vm1 = vcmp.lt.s32.totalorder %v2351_v16, 7  ;;  %v485_v47 = vadd.s32 16, %v2351_v16  ;;  %v486_v48 = vadd.s32 24, %v2351_v16 }
  0x48   : > { %923 = vmatpush.bf16.msra.mxu1 %v1768_v4  ;;  %v1772_v19 = vld [vmem:[#allocation5 + $0x90] sm:$0xff]  ;;  %v2354_v20 = vld [vmem:[%s2337_s9] sm:$0xff]  ;;  %v475_v21 = vld [vmem:[%s2337_s9 + $0x8] sm:$0xff]  ;;  %v502_v32 = vand.u32 7, %v484_v23  ;;  %vm1803_vm3 = vcmp.ne.s32.totalorder %v495_v25, 0  ;;  %vm1811_vm5 = vcmp.ne.s32.totalorder %v495_v25, 7 }
  0x49   : > { %952 = vmatpush.bf16.msra.mxu2 %v1776_v5  ;;  %v2358_v22 = vld [vmem:[%s2337_s9 + $0x38] sm:$0xff]  ;;  %v2362_v24 = vld [vmem:[%s2337_s9 + $0x10] sm:$0xff]  ;;  %v1755_v26 = vld [vmem:[#allocation5 + $0x8] sm:$0xff]  ;;  %v595_v28 = vrot.slane %v2354_v20, 7  ;;  %v596_v29 = vrot.slane %v475_v21, 7  ;;  %v644_v33 = vrot.slane %v2354_v20, 1  ;;  %v686_v44 = vpack.c.bf16 %v475_v21, %v2354_v20 }
  0x4a   : > { %v1763_v27 = vld [vmem:[#allocation5 + $0x48] sm:$0xff]  ;;  %v602_v30 = vrot.slane %v2358_v22, 7  ;;  %v645_v34 = vrot.slane %v475_v21, 1  ;;  %v646_v35 = vrot.slane %v2362_v24, 1  ;;  %v1754_v36 = vld [vmem:[#allocation5] sm:$0xff]  ;;  %vm1802_vm2 = vcmp.ne.s32.totalorder %v502_v32, 0 }
  0x4b   : > { %895 = vmatpush.bf16.msra.mxu0 %v1759_v6  ;;  %v1771_v31 = vld [vmem:[#allocation5 + $0x88] sm:$0xff]  ;;  %v1762_v37 = vld [vmem:[#allocation5 + $0x40] sm:$0xff]  ;;  %v610_v38 = vsel %vm603_vm0, %v595_v28, %v596_v29  ;;  %vm1810_vm4 = vcmp.ne.s32.totalorder %v502_v32, 7  ;;  %vm1615_vm6 = vmpackc.low %vm1802_vm2, %vm1803_vm3  ;;  %v597_v50 = vrot.slane %v2362_v24, 7  ;;  %v509_v52 = vand.u32 7, %v485_v47  ;;  %s2089_s27 = scalar_lea.hbm %s2088_s21, 8 }
  0x4c   : > { %924 = vmatpush.bf16.msra.mxu1 %v1767_v7  ;;  %v611_v39 = vsel %vm603_vm0, %v602_v30, %v595_v28  ;;  %v1770_v40 = vld [vmem:[#allocation5 + $0x80] sm:$0xff]  ;;  %v658_v41 = vsel %vm652_vm1, %v645_v34, %v646_v35  ;;  %v659_v42 = vsel %vm652_vm1, %v644_v33, %v645_v34  ;;  %vm1635_vm7 = vmpackc.low %vm1810_vm4, %vm1811_vm5  ;;  %v477_v46 = vld [vmem:[%s2337_s9 + $0x18] sm:$0xff]  ;;  %v516_v53 = vand.u32 7, %v486_v48  ;;  %p2090_p1 = scmp.ne.s32.totalorder %s2088_s21, %s2089_s27  ;;  %s2093_s1 = scalar_lea.hbm %s2506_s11, 16 }
  0x4d   : > { %953 = vmatpush.bf16.msra.mxu2 %v1775_v8  ;;  %v1616_v43 = vpack.c.bf16 %v610_v38, %v611_v39  ;;  %v1636_v45 = vpack.c.bf16 %v658_v41, %v659_v42  ;;  %v478_v49 = vld [vmem:[%s2337_s9 + $0x20] sm:$0xff]  ;;  %v598_v51 = vrot.slane %v477_v46, 7  ;;  %v647_v54 = vrot.slane %v477_v46, 1  ;;  %v479_v63 = vld [vmem:[%s2337_s9 + $0x28] sm:$0xff]  ;;  %v480_v2 = vld [vmem:[%s2337_s9 + $0x30] sm:$0xff]  ;;  %p2095_p2 = scmp.lt.s32.totalorder %s2093_s1, %s2089_s27 }
  0x4e   : > { %v648_v55 = vrot.slane %v478_v49, 1  ;;  %v609_v57 = vsel %vm603_vm0, %v596_v29, %v597_v50  ;;  %vm1804_vm8 = vcmp.ne.s32.totalorder %v516_v53, 0  ;;  %vm1805_vm9 = vcmp.ne.s32.totalorder %v509_v52, 0  ;;  %v1785_v41 = vld [vmem:[#allocation7 + $0x38] sm:$0xff]  ;;  %v1784_v42 = vld [vmem:[#allocation7 + $0x30] sm:$0xff]  ;;  %p2091_p4 = pnand %p2090_p1, %p2303_p3 }
  0x4f   : > { %896 = vmatpush.bf16.msra.mxu0 %v1758_v9  ;;  %v608_v56 = vsel %vm603_vm0, %v597_v50, %v598_v51  ;;  %v657_v59 = vsel %vm652_vm1, %v646_v35, %v647_v54  ;;  %vm1812_vm10 = vcmp.ne.s32.totalorder %v516_v53, 7  ;;  %vm1813_vm11 = vcmp.ne.s32.totalorder %v509_v52, 7  ;;  %vm1620_vm12 = vmpackc.low %vm1804_vm8, %vm1805_vm9  ;;  %1159 = vmatpush.bf16.msra.mxu3 %v1785_v41  ;;  %v1783_v50 = vld [vmem:[#allocation7 + $0x28] sm:$0xff]  ;;  %p2096_p9 = por %p2095_p2, %p2094_p11 }
  0x50   : > { %925 = vmatpush.bf16.msra.mxu1 %v1766_v10  ;;  %v656_v58 = vsel %vm652_vm1, %v647_v54, %v648_v55  ;;  %v1621_v60 = vpack.c.bf16 %v608_v56, %v609_v57  ;;  %v689_v61 = vpack.c.bf16 %v477_v46, %v2362_v24  ;;  %vm1640_vm13 = vmpackc.low %vm1812_vm10, %vm1813_vm11  ;;  %v487_v0 = vadd.s32 32, %v2351_v16  ;;  %p2092_p8 = pneg %p2091_p4 }
  0x51   : > { %954 = vmatpush.bf16.msra.mxu2 %v1774_v11  ;;  %v1641_v62 = vpack.c.bf16 %v656_v58, %v657_v59  ;;  %v488_v1 = vadd.s32 40, %v2351_v16  ;;  %v599_v3 = vrot.slane %v478_v49, 7  ;;  %v600_v4 = vrot.slane %v479_v63, 7  ;;  %v1782_v58 = vld [vmem:[#allocation7 + $0x20] sm:$0xff] }
  0x52   : > { %v523_v5 = vand.u32 7, %v487_v0  ;;  %v649_v7 = vrot.slane %v479_v63, 1  ;;  %v650_v8 = vrot.slane %v480_v2, 1  ;;  %v651_v24 = vrot.slane %v2358_v22, 1  ;;  %p2097_p10 = pnand %p2096_p9, %p2092_p8 }
  0x53   : > { %897 = vmatpush.bf16.msra.mxu0 %v1757_v13  ;;  %v530_v6 = vand.u32 7, %v488_v1  ;;  %v606_v9 = vsel %vm603_vm0, %v599_v3, %v600_v4  ;;  %v607_v10 = vsel %vm603_vm0, %v598_v51, %v599_v3  ;;  %1160 = vmatpush.bf16.msra.mxu3 %v1784_v42 }
  0x54   : > { %926 = vmatpush.bf16.msra.mxu1 %v1765_v14  ;;  %vm1807_vm15 = vcmp.ne.s32.totalorder %v523_v5, 0  ;;  %v654_v11 = vsel %vm652_vm1, %v649_v7, %v650_v8  ;;  %v655_v12 = vsel %vm652_vm1, %v648_v55, %v649_v7  ;;  %vm1815_vm3 = vcmp.ne.s32.totalorder %v523_v5, 7 }
  0x55   : > { %955 = vmatpush.bf16.msra.mxu2 %v1773_v15  ;;  %vm1806_vm14 = vcmp.ne.s32.totalorder %v530_v6, 0  ;;  %vm1814_vm2 = vcmp.ne.s32.totalorder %v530_v6, 7  ;;  %v1626_v13 = vpack.c.bf16 %v606_v9, %v607_v10  ;;  %v692_v14 = vpack.c.bf16 %v479_v63, %v478_v49 }
  0x56   : > { %vm1625_vm4 = vmpackc.low %vm1806_vm14, %vm1807_vm15  ;;  %v1646_v15 = vpack.c.bf16 %v654_v11, %v655_v12  ;;  %v660_v28 = vsel %vm652_vm1, %v651_v24, %v644_v33  ;;  %v2157_v6 = vmov 8.0   ;;  %v1780_v11 = vld [vmem:[#allocation7 + $0x10] sm:$0xff]  ;;  %vm1101_vm14 = vcmask 1044484  }
  0x57   : > { %898 = vmatpush.bf16.msra.mxu0 %v1756_v17  ;;  %vm1645_vm5 = vmpackc.low %vm1814_vm2, %vm1815_vm3  ;;  %v489_v17 = vadd.s32 48, %v2351_v16  ;;  %1161 = vmatpush.bf16.msra.mxu3 %v1783_v50  ;;  %1917 = vrcp.f32 %v2157_v6  ;;  %vm1103_vm15 = vcmask 1045509   ;;  %vm1105_vm2 = vcmask 1046534  }
  0x58   : > { %927 = vmatpush.bf16.msra.mxu1 %v1764_v18  ;;  %v490_v18 = vadd.s32 56, %v2351_v16  ;;  %vm1107_vm3 = vcmask 1047559  }
  0x59   : > { %956 = vmatpush.bf16.msra.mxu2 %v1772_v19  ;;  %v601_v19 = vrot.slane %v480_v2, 7  ;;  %v537_v21 = vand.u32 7, %v489_v17  ;;  %v1779_v17 = vld [vmem:[#allocation7 + $0x8] sm:$0xff] }
  0x5a   : > { %v544_v23 = vand.u32 7, %v490_v18 }
  0x5b   : > { %899 = vmatpush.bf16.msra.mxu0 %v1755_v26  ;;  %v604_v25 = vsel %vm603_vm0, %v601_v19, %v602_v30  ;;  %v605_v26 = vsel %vm603_vm0, %v600_v4, %v601_v19  ;;  %vm1817_vm9 = vcmp.ne.s32.totalorder %v537_v21, 7  ;;  %1162 = vmatpush.bf16.msra.mxu3 %v1782_v58 }
  0x5c   : > { %928 = vmatpush.bf16.msra.mxu1 %v1763_v27  ;;  %v653_v27 = vsel %vm652_vm1, %v650_v8, %v651_v24  ;;  %vm1816_vm8 = vcmp.ne.s32.totalorder %v544_v23, 7  ;;  %v1631_v29 = vpack.c.bf16 %v604_v25, %v605_v26  ;;  %vm1095_vm1 = vcmask 1041409  }
  0x5d   : > { %957 = vmatpush.bf16.msra.mxu2 %v1771_v31  ;;  %v695_v31 = vpack.c.bf16 %v2358_v22, %v480_v2  ;;  %v1651_v30 = vpack.c.bf16 %v660_v28, %v653_v27  ;;  %vm1650_vm11 = vmpackc.low %vm1816_vm8, %vm1817_vm9  ;;  %v2429_v22 = vld [vmem:[%s2497_s2] ss:$0 sm:$0xff]  ;;  %v1781_v2 = vld [vmem:[#allocation7 + $0x18] sm:$0xff] }
  0x5f   : > { %900 = vmatpush.bf16.msra.mxu0 %v1754_v36  ;;  %1163 = vmatpush.bf16.msra.mxu3 %v1781_v2 }
  0x60   : > { %929 = vmatpush.bf16.msra.mxu1 %v1762_v37 }
  0x61   : > { %958 = vmatpush.bf16.msra.mxu2 %v1770_v40 }
  0x62   : > { %1617 = vmatmul.msk.bf16.vlgmr.msra.gmra.mxu0 %vm1615_vm6, %v1616_v43  ;;  %vm1808_vm6 = vcmp.ne.s32.totalorder %v544_v23, 0 }
  0x63   : > { %930 = vmatmul.bf16.vlgmr.msra.gmra.mxu1 %v686_v44  ;;  %1164 = vmatpush.bf16.msra.mxu3 %v1780_v11 }
  0x64   : > { %1637 = vmatmul.msk.bf16.vlgmr.msra.gmra.mxu2 %vm1635_vm7, %v1636_v45  ;;  %vm1809_vm7 = vcmp.ne.s32.totalorder %v537_v21, 0  ;;  %v2437_v21 = vpop.eup %1917 }
  0x65   : > { %vm1630_vm10 = vmpackc.low %vm1808_vm6, %vm1809_vm7  ;;  %vm1041_vm0 = vweird.f32 %v2437_v21 }
  0x67   : > { %1165 = vmatpush.bf16.msra.mxu3 %v1779_v17 }
  0x72   : > { %1622 = vmatmul.msk.bf16.gmra.mxu0 %vm1620_vm12, %v1621_v60  ;;  %vm1097_vm12 = vcmask 1042434  }
  0x73   : > { %935 = vmatmul.bf16.gmra.mxu1 %v689_v61 }
  0x74   : > { %1642 = vmatmul.msk.bf16.gmra.mxu2 %vm1640_vm13, %v1641_v62  ;;  %vm1099_vm13 = vcmask 1043459  }
  0x82   : > { %1627 = vmatmul.msk.bf16.gmra.mxu0 %vm1625_vm4, %v1626_v13 }
  0x83   : > { %940 = vmatmul.bf16.gmra.mxu1 %v692_v14 }
  0x84   : > { %1647 = vmatmul.msk.bf16.gmra.mxu2 %vm1645_vm5, %v1646_v15 }
  0x92   : > { %1632 = vmatmul.msk.bf16.gmra.mxu0 %vm1630_vm10, %v1631_v29 }
  0x93   : > { %945 = vmatmul.bf16.gmra.mxu1 %v695_v31 }
  0x94   : > { %1652 = vmatmul.msk.bf16.gmra.mxu2 %vm1650_vm11, %v1651_v30  ;;  %v1778_v30 = vld [vmem:[#allocation7] sm:$0xff] }
  0x95   : > { %1166 = vmatpush.bf16.msra.mxu3 %v1778_v30 }
  0xdf   : > { %v902_v32 = vpop.f32.mrf.mxu0 }
  0xe0   : > { %v931_v34 = vpop.f32.mrf.mxu1  ;;  %v903_v44 = vadd.f32 %v2429_v22, %v902_v32  ;;  %v1037_v32 = vmul.f32 8.0, %v2437_v21 }
  0xe2   : > { %v932_v53 = vadd.f32 %v931_v34, %v903_v44 }
  0xe7   : > { %v960_v35 = vpop.f32.mrf.mxu2  ;;  %v904_v36 = vpop.f32.mrf.mxu0 }
  0xe8   : > { %v933_v37 = vpop.f32.mrf.mxu1  ;;  %v905_v45 = vadd.f32 %v2429_v22, %v904_v36  ;;  %v961_v60 = vadd.f32 %v960_v35, %v932_v53 }
  0xea   : > { %v934_v54 = vadd.f32 %v933_v37, %v905_v45  ;;  %v980_v5 = vmax.f32 %v961_v60, 0.0 }
  0xec   : > { %v988_v13 = vrot.slane %v980_v5, 4 }
  0xee   : > { %v989_v28 = vadd.f32 %v988_v13, %v980_v5 }
  0xef   : > { %v962_v20 = vpop.f32.mrf.mxu2  ;;  %v907_v38 = vpop.f32.mrf.mxu0 }
  0xf0   : > { %v936_v16 = vpop.f32.mrf.mxu1  ;;  %v908_v43 = vadd.f32 %v2429_v22, %v907_v38  ;;  %v963_v55 = vadd.f32 %v962_v20, %v934_v54 }
  0xf2   : > { %v937_v51 = vadd.f32 %v936_v16, %v908_v43  ;;  %v981_v63 = vmax.f32 %v963_v55, 0.0  ;;  %v990_v16 = vrot.slane %v989_v28, 2  ;;  %v1792_v55 = vld [vmem:[#allocation8 + $0x30] sm:$0xff] }
  0xf4   : > { %v994_v10 = vrot.slane %v981_v63, 4 }
  0xf6   : > { %v995_v23 = vadd.f32 %v994_v10, %v981_v63 }
  0xf7   : > { %v965_v33 = vpop.f32.mrf.mxu2  ;;  %v909_v39 = vpop.f32.mrf.mxu0 }
  0xf8   : > { %v938_v40 = vpop.f32.mrf.mxu1  ;;  %v910_v47 = vadd.f32 %v2429_v22, %v909_v39  ;;  %v966_v59 = vadd.f32 %v965_v33, %v937_v51  ;;  %v996_v36 = vrot.slane %v995_v23, 2 }
  0xfa   : > { %v939_v56 = vadd.f32 %v938_v40, %v910_v47  ;;  %v982_v3 = vmax.f32 %v966_v59, 0.0  ;;  %v1038_v40 = vsub.f32 1.0, %v1037_v32  ;;  %v997_v43 = vadd.f32 %v996_v36, %v995_v23 }
  0xfc   : > { %v1000_v12 = vrot.slane %v982_v3, 4  ;;  %v1039_v53 = vmul.f32 %v2437_v21, %v1038_v40 }
  0xfe   : > { %v1001_v26 = vadd.f32 %v1000_v12, %v982_v3  ;;  %v1791_v3 = vld [vmem:[#allocation8 + $0x28] sm:$0xff] }
  0xff   : > { %v967_v46 = vpop.f32.mrf.mxu2  ;;  %v912_v48 = vpop.f32.mrf.mxu0 }
 0x100   : > { %v941_v49 = vpop.f32.mrf.mxu1  ;;  %v913_v52 = vadd.f32 %v2429_v22, %v912_v48  ;;  %v968_v61 = vadd.f32 %v967_v46, %v939_v56  ;;  %v1002_v38 = vrot.slane %v1001_v26, 2  ;;  %v1793_v48 = vld [vmem:[#allocation8 + $0x38] sm:$0xff]  ;;  %v998_v56 = vrot.slane %v997_v43, 1 }
 0x101   : > { %1242 = vmatpush.bf16.msrb.mxu3 %v1793_v48 }
 0x102   : > { %v942_v57 = vadd.f32 %v941_v49, %v913_v52  ;;  %v983_v7 = vmax.f32 %v968_v61, 0.0  ;;  %v1003_v47 = vadd.f32 %v1002_v38, %v1001_v26  ;;  %v991_v49 = vadd.f32 %v990_v16, %v989_v28  ;;  %v1788_v16 = vld [vmem:[#allocation8 + $0x10] sm:$0xff] }
 0x104   : > { %v1006_v14 = vrot.slane %v983_v7, 4  ;;  %v1004_v59 = vrot.slane %v1003_v47, 1  ;;  %v992_v61 = vrot.slane %v991_v49, 1 }
 0x105   : > { %1243 = vmatpush.bf16.msrb.mxu3 %v1792_v55 }
 0x106   : > { %v1007_v29 = vadd.f32 %v1006_v14, %v983_v7 }
 0x107   : > { %v970_v62 = vpop.f32.mrf.mxu2  ;;  %v914_v1 = vpop.f32.mrf.mxu0 }
 0x108   : > { %v971_v0 = vadd.f32 %v970_v62, %v942_v57  ;;  %v943_v4 = vpop.f32.mrf.mxu1  ;;  %v915_v8 = vadd.f32 %v2429_v22, %v914_v1  ;;  %v1008_v33 = vrot.slane %v1007_v29, 2  ;;  %v1040_v1 = vadd.f32 %v2437_v21, %v1039_v53 }
 0x109   : > { %1244 = vmatpush.bf16.msrb.mxu3 %v1791_v3  ;;  %v1913_v3 = vld [vmem:[%s2501_s6] ss:$0 sm:$0xff] }
 0x10a   : > { %v984_v9 = vmax.f32 %v971_v0, 0.0  ;;  %v944_v15 = vadd.f32 %v943_v4, %v915_v8  ;;  %v1009_v50 = vadd.f32 %v1008_v33, %v1007_v29  ;;  %v999_v4 = vadd.f32 %v998_v56, %v997_v43 }
 0x10b   : > { %v1005_v8 = vadd.f32 %v1004_v59, %v1003_v47  ;;  %v1042_v13 = vsel %vm1041_vm0, %v2437_v21, %v1040_v1 }
 0x10c   : > { %v1012_v18 = vrot.slane %v984_v9, 4  ;;  %v1010_v62 = vrot.slane %v1009_v50, 1  ;;  %v1044_v17 = vmul.f32 %v1042_v13, %v999_v4 }
 0x10e   : > { %v1013_v34 = vadd.f32 %v1012_v18, %v984_v9  ;;  %v993_v9 = vadd.f32 %v992_v61, %v991_v49  ;;  %v1011_v10 = vadd.f32 %v1010_v62, %v1009_v50  ;;  %v1052_v30 = vpack.c.bf16 %v1044_v17, %v1044_v17  ;;  %v1786_v61 = vld [vmem:[#allocation8] sm:$0xff]  ;;  %v1797_v17 = vld [vmem:[#allocation10 + $0x18] sm:$0xff] }
 0x10f   : > { %v972_v19 = vpop.f32.mrf.mxu2  ;;  %v917_v25 = vpop.f32.mrf.mxu0  ;;  %v1912_v62 = vld [vmem:[%s2499_s4] ss:$0 sm:$0xff] }
 0x110   : > { %v973_v24 = vadd.f32 %v972_v19, %v944_v15  ;;  %v918_v27 = vadd.f32 %v2429_v22, %v917_v25  ;;  %v946_v35 = vpop.f32.mrf.mxu1  ;;  %v1014_v41 = vrot.slane %v1013_v34, 2  ;;  %v1790_v15 = vld [vmem:[#allocation8 + $0x20] sm:$0xff]  ;;  %v1043_v25 = vmul.f32 %v1042_v13, %v993_v9  ;;  %v1801_v9 = vld [vmem:[#allocation10 + $0x38] sm:$0xff] }
 0x111   : > { %v1046_v26 = vmul.f32 %v1042_v13, %v1011_v10  ;;  %1245 = vmatpush.bf16.msrb.mxu3 %v1790_v15  ;;  %v1088_v33 = vunpack.c.l.b16 %v1052_v30  ;;  %1362 = vmatpush.bf16.msrb.mxu0 %v1801_v9  ;;  %v1800_v10 = vld [vmem:[#allocation10 + $0x30] sm:$0xff] }
 0x112   : > { %v985_v31 = vmax.f32 %v973_v24, 0.0  ;;  %v947_v20 = vadd.f32 %v946_v35, %v918_v27  ;;  %v1015_v54 = vadd.f32 %v1014_v41, %v1013_v34  ;;  %v1045_v24 = vmul.f32 %v1042_v13, %v1005_v8 }
 0x113   : > { %v1051_v36 = vpack.c.bf16 %v1043_v25, %v1043_v25  ;;  %v2158_v8 = vmov 128.0  }
 0x114   : > { %v1018_v37 = vrot.slane %v985_v31, 4  ;;  %v1016_v2 = vrot.slane %v1015_v54, 1  ;;  %v1053_v35 = vpack.c.bf16 %v1045_v24, %v1045_v24  ;;  %1919 = vrcp.f32 %v2158_v8 }
 0x115   : > { %v1087_v43 = vunpack.c.l.b16 %v1051_v36  ;;  %1363 = vmatpush.bf16.msrb.mxu0 %v1800_v10 }
 0x116   : > { %v1019_v39 = vadd.f32 %v1018_v37, %v985_v31  ;;  %v1017_v14 = vadd.f32 %v1016_v2, %v1015_v54  ;;  %v1789_v31 = vld [vmem:[#allocation8 + $0x18] sm:$0xff]  ;;  %v1054_v37 = vpack.c.bf16 %v1046_v26, %v1046_v26  ;;  %v1089_v41 = vunpack.c.l.b16 %v1053_v35 }
 0x117   : > { %v975_v42 = vpop.f32.mrf.mxu2  ;;  %v919_v46 = vpop.f32.mrf.mxu0  ;;  %1246 = vmatpush.bf16.msrb.mxu3 %v1789_v31  ;;  %v1096_v47 = vsel %vm1095_vm1, %v1088_v33, %v1087_v43  ;;  %v1794_v31 = vld [vmem:[#allocation10] sm:$0xff] }
 0x118   : > { %v1020_v44 = vrot.slane %v1019_v39, 2  ;;  %v976_v45 = vadd.f32 %v975_v42, %v947_v20  ;;  %v920_v52 = vadd.f32 %v2429_v22, %v919_v46  ;;  %v948_v60 = vpop.f32.mrf.mxu1  ;;  %v1047_v29 = vmul.f32 %v1042_v13, %v1017_v14  ;;  %v1798_v14 = vld [vmem:[#allocation10 + $0x20] sm:$0xff] }
 0x11a   : > { %v986_v51 = vmax.f32 %v976_v45, 0.0  ;;  %v1021_v57 = vadd.f32 %v1020_v44, %v1019_v39  ;;  %v949_v0 = vadd.f32 %v948_v60, %v920_v52  ;;  %v1055_v38 = vpack.c.bf16 %v1047_v29, %v1047_v29  ;;  %v1787_v60 = vld [vmem:[#allocation8 + $0x8] sm:$0xff] }
 0x11b   : > { %v1090_v44 = vunpack.c.l.b16 %v1054_v37  ;;  %1247 = vmatpush.bf16.msrb.mxu3 %v1788_v16  ;;  %v1795_v29 = vld [vmem:[#allocation10 + $0x8] sm:$0xff]  ;;  %v1914_v16 = vld [vmem:[%s2502_s7] ss:$0 sm:$0xff] }
 0x11c   : > { %v1024_v58 = vrot.slane %v986_v51, 4  ;;  %v1022_v5 = vrot.slane %v1021_v57, 1  ;;  %v1091_v46 = vunpack.c.l.b16 %v1055_v38 }
 0x11e   : > { %v1025_v63 = vadd.f32 %v1024_v58, %v986_v51  ;;  %v1023_v18 = vadd.f32 %v1022_v5, %v1021_v57  ;;  %v1098_v51 = vsel %vm1097_vm12, %v1089_v41, %v1096_v47 }
 0x11f   : > { %v977_v22 = vpop.f32.mrf.mxu2  ;;  %v1100_v53 = vsel %vm1099_vm13, %v1090_v44, %v1098_v51  ;;  %1248 = vmatpush.bf16.msrb.mxu3 %v1787_v60  ;;  %v1916_v44 = vld [vmem:[%s2505_s10] ss:$0 sm:$0xff] }
 0x120   : > { %v1026_v6 = vrot.slane %v1025_v63, 2  ;;  %v978_v7 = vadd.f32 %v977_v22, %v949_v0  ;;  %v1048_v32 = vmul.f32 %v1042_v13, %v1023_v18  ;;  %v1102_v54 = vsel %vm1101_vm14, %v1091_v46, %v1100_v53 }
 0x122   : > { %v1027_v11 = vadd.f32 %v1026_v6, %v1025_v63  ;;  %v987_v12 = vmax.f32 %v978_v7, 0.0  ;;  %v1056_v39 = vpack.c.bf16 %v1048_v32, %v1048_v32 }
 0x123   : > { %1249 = vmatpush.bf16.msrb.mxu3 %v1786_v61 }
 0x124   : > { %v1028_v19 = vrot.slane %v1027_v11, 1  ;;  %v1030_v23 = vrot.slane %v987_v12, 4  ;;  %v1092_v48 = vunpack.c.l.b16 %v1056_v39 }
 0x126   : > { %v1029_v27 = vadd.f32 %v1028_v19, %v1027_v11  ;;  %v1031_v28 = vadd.f32 %v1030_v23, %v987_v12  ;;  %v1104_v56 = vsel %vm1103_vm15, %v1092_v48, %v1102_v54  ;;  %v1920_v11 = vpop.eup %1919  ;;  %v1799_v12 = vld [vmem:[#allocation10 + $0x28] sm:$0xff] }
 0x127   : > { %1364 = vmatpush.bf16.msrb.mxu0 %v1799_v12  ;;  %vm1263_vm4 = vweird.f32 %v1920_v11 }
 0x128   : > { %v1032_v34 = vrot.slane %v1031_v28, 2  ;;  %v1049_v21 = vmul.f32 %v1042_v13, %v1029_v27 }
 0x12a   : > { %v1033_v20 = vadd.f32 %v1032_v34, %v1031_v28  ;;  %v1057_v42 = vpack.c.bf16 %v1049_v21, %v1049_v21  ;;  %v1796_v28 = vld [vmem:[#allocation10 + $0x10] sm:$0xff] }
 0x12b   : > { %1365 = vmatpush.bf16.msrb.mxu0 %v1798_v14 }
 0x12c   : > { %v1034_v40 = vrot.slane %v1033_v20, 1  ;;  %v1093_v50 = vunpack.c.l.b16 %v1057_v42 }
 0x12e   : > { %v1035_v45 = vadd.f32 %v1034_v40, %v1033_v20  ;;  %v1106_v57 = vsel %vm1105_vm2, %v1093_v50, %v1104_v56  ;;  %v1915_v40 = vld [vmem:[%s2503_s8] ss:$0 sm:$0xff] }
 0x12f   : > { %1366 = vmatpush.bf16.msrb.mxu0 %v1797_v17 }
 0x130   : > { %v1050_v49 = vmul.f32 %v1042_v13, %v1035_v45  ;;  %v1259_v13 = vmul.f32 128.0, %v1920_v11 }
 0x132   : > { %v1058_v52 = vpack.c.bf16 %v1050_v49, %v1050_v49  ;;  %v1260_v15 = vsub.f32 1.0, %v1259_v13 }
 0x133   : > { %1367 = vmatpush.bf16.msrb.mxu0 %v1796_v28 }
 0x134   : > { %v1094_v55 = vunpack.c.l.b16 %v1058_v52  ;;  %v1261_v18 = vmul.f32 %v1920_v11, %v1260_v15 }
 0x136   : > { %v1108_v58 = vsel %vm1107_vm3, %v1094_v55, %v1106_v57  ;;  %v1262_v19 = vadd.f32 %v1920_v11, %v1261_v18 }
 0x137   : > { %v1109_v59 = vpack.c.b16 %v1108_v58, %v1108_v58  ;;  %1368 = vmatpush.bf16.msrb.mxu0 %v1795_v29 }
 0x138   : > { %v1264_v23 = vsel %vm1263_vm4, %v1920_v11, %v1262_v19 }
 0x139   : > { %1167 = vmatmul.bf16.vlgmr.msra.gmra.mxu3 %v1109_v59 }
 0x13b   : > { %1369 = vmatpush.bf16.msrb.mxu0 %v1794_v31 }
 0x1bc   : > { %v1168_v63 = vpop.f32.mrf.mxu3 }
 0x1bd   : > { %v1169_v0 = vadd.f32 %v1912_v62, %v1168_v63 }
 0x1bf   : > { %v1172_v1 = vmax.f32 %v1169_v0, 0.0 }
 0x1c1   : > { %v1173_v2 = vpack.c.bf16 %v1172_v1, %v1172_v1 }
 0x1c3   : > { %1250 = vmatmul.bf16.vlgmr.msrb.gmra.mxu3 %v1173_v2 }
 0x1c4   : > { %v1170_v22 = vpop.f32.mrf.mxu3 }
 0x246   : > { %v1251_v4 = vpop.f32.mrf.mxu3 }
 0x247   : > { %v1252_v5 = vadd.f32 %v1913_v3, %v1251_v4 }
 0x249   : > { %v1255_v6 = vadd.f32 %v1252_v5, %v1169_v0 }
 0x24b   : > { %1256 = vadd.xlane.f32.xlu0 %v1255_v6 }
 0x24e   : > { %v1253_v7 = vpop.f32.mrf.mxu3 }
 0x2be   : > { %v1257_v24 = vpop.xlane.xlu0 %1256 }
 0x2bf   : > { %v1265_v25 = vmul.f32 %v1264_v23, %v1257_v24 }
 0x2c1   : > { %v1266_v26 = vsub.f32 %v1255_v6, %v1265_v25 }
 0x2c3   : > { %v1267_v27 = vmul.f32 %v1266_v26, %v1266_v26 }
 0x2c5   : > { %1268 = vadd.xlane.f32.xlu0 %v1267_v27 }
 0x338   : > { %v1269_v30 = vpop.xlane.xlu0 %1268 }
 0x339   : > { %v1270_v32 = vmul.f32 %v1269_v30, %v1264_v23 }
 0x33b   : > { %v1271_v34 = vadd.f32 1e-05, %v1270_v32 }
 0x33d   : > { %1921 = vrsqrt.f32 %v1271_v34  ;;  %vm1278_vm6 = vweird.f32 %v1271_v34 }
 0x343   : > { %v1922_v35 = vpop.eup %1921 }
 0x344   : > { %v1273_v21 = vmul.f32 %v1922_v35, %v1271_v34  ;;  %vm1279_vm5 = vweird.f32 %v1922_v35 }
 0x345   : > { %vm1280_vm7 = vmor %vm1278_vm6, %vm1279_vm5 }
 0x346   : > { %v1274_v36 = vmul.f32 %v1922_v35, %v1273_v21 }
 0x348   : > { %v1275_v37 = vmul.f32 0.5, %v1274_v36 }
 0x34a   : > { %v1276_v20 = vsub.f32 1.5, %v1275_v37 }
 0x34c   : > { %v1277_v38 = vmul.f32 %v1922_v35, %v1276_v20 }
 0x34e   : > { %v1281_v33 = vsel %vm1280_vm7, %v1922_v35, %v1277_v38 }
 0x34f   : > { %v1282_v39 = vmul.f32 %v1281_v33, %v1266_v26 }
 0x351   : > { %v1287_v41 = vmul.f32 %v1914_v16, %v1282_v39 }
 0x353   : > { %v1292_v42 = vadd.f32 %v1915_v40, %v1287_v41 }
 0x355   : > { %v1293_v43 = vpack.c.bf16 %v1292_v42, %v1292_v42 }
 0x357   : > { %1370 = vmatmul.bf16.vlgmr.msrb.gmra.mxu0 %v1293_v43 }
 0x3d4   : > { %v1371_v45 = vpop.f32.mrf.mxu0 }
 0x3d5   : > { %v1372_v46 = vadd.f32 %v1916_v44, %v1371_v45 }
 0x3d7   : > { %1375 = vst [vmem:[%s472_s29] sm:$0xff] %v1372_v46 }
 0x3d8   : > { %2100 = shalt.err (!%p2097_p10)
}
 0x3d9   : > { %1836 = dma.vmem_to_hbm [thread:$0]  (%p2303_p3), %s1390_s13, 128, %s1392_s26, %s1377_s22  }
 0x3dc   : > { %v1373_v47 = vpop.f32.mrf.mxu0 }
 0x3dd PF: > { %s1403_s9 = sand.u32 1, %s2135_s17   ;;  %p2524_p12 = scmp.ge.s32.totalorder %s2147_s20, 2 }
 0x3de   : > { %s1404_s3 = scalar_lea.sflag [#allocation4], %s1403_s9 }
 0x3df   : > { %p1856_p13 = pnand %p2524_p12, %p2254_p6 }
 0x3e1   : > { %p1857_p0 = pneg %p1856_p13 }
 0x3e3   : > { %2130 = dma.done.wait (%p1857_p0), %s1404_s3, 128  }
 0x3e4   : > { %2132 = vsyncadd (%p1857_p0), %s1404_s3, 4294967168  ;;  %p26_p5 = scmp.ge.s32.totalorder %s2293_s15, 4   ;;  %s2525_s17 = smov %s2139_s18 }
 0x3e5   : > { %s2526_s18 = smov %s2143_s19  ;;  %s2527_s19 = smov %s2309_s24 }
 0x3e6   : > { %s2528_s20 = smov %s2293_s15  ;;  %28 = sbr.rel (!%p26_p5) target bundleno = 12 (0xc), region = 125 }
 0x3eb   :  { %1410 = vsyncpa [#allocation3], 1 }
 0x3ec   :  { %1412 = vsyncpa [#allocation3 + $0x1], 1 }
 0x3ed   :  { %1413 = vsyncpa [#allocation6], 1 }
 0x3ee   :  { %1414 = vsyncpa [#allocation9], 1 }
 0x3ef   :  { %1415 = vsyncpa [#allocation4], 1 }
 0x3f0   :  { %1417 = vsyncpa [#allocation4 + $0x1], 1 }

</bundles_post_ra>
